<compile_context>
chip_gen: v7x
topology: tpu7x:2x2x1
jax: 0.10.0
libtpu: 0.0.40
codegen_flags: <defaults>
</compile_context>

<pallas_src>
import jax
import jax.numpy as jnp
from jax import lax
from jax.experimental import pallas as pl
from jax.experimental.pallas import tpu as pltpu

HI = lax.Precision.HIGHEST  # for the pure-JAX f32 references
LANE = 128
MIB = 1 << 20


def _pick_lane_tiling(p, max_tile):
    """Pick a lane-axis tile: a multiple of 128, <= max_tile, and small enough
    that the grid has >= 2 steps whenever >= 2 lane tiles exist (so the
    'parallel' grid actually feeds both v7x TensorCores).  Returns (tile, padded_p)."""
    p_tiles = pl.cdiv(p, LANE)
    req_tiles = max(1, max_tile // LANE)
    if p_tiles >= 2:
        req_tiles = min(req_tiles, max(1, p_tiles // 2))
    tile = min(req_tiles, p_tiles) * LANE
    padded = pl.cdiv(p, tile) * tile
    return tile, padded


def _vmem_limit(estimate_bytes):
    """Estimate + 25% + 2 MiB headroom, never below the 32 MiB scoped default
    (raises v5e's 16 MiB default), capped at v7x's 64 MiB physical VMEM."""
    return min(max(estimate_bytes + estimate_bytes // 4 + 2 * MIB, 32 * MIB),
               64 * MIB)


# ----------------------------------------------------------------------------
# FastRCNNPredictor: cls_score + bbox_pred fused into a single matmul,
# transposed so R sits on the 128-lane axis (lane-dense stores).
#   x_T   : (1024, TILE_R)  bf16
#   w_all : (10, 1024)      bf16   [cls | bbox] stacked along the output dim
#   b_all : (10, 1)         f32
#   out   : (10, TILE_R)    f32    lane-dense stores
# ----------------------------------------------------------------------------
def box_predictor_kernel(x_ref, w_ref, b_ref, out_ref):
    out_ref[...] = (jnp.dot(w_ref[...], x_ref[...],
                            preferred_element_type=jnp.float32)
                    + b_ref[...])


def run_box_predictor(box_feats, wc, bc, wb, bb, *, tile_r=2048):
    """box_feats: (R, C) f32.  wc/bc, wb/bb are PyTorch-style Linear params
    (weight shape = (out_features, in_features))."""
    R, C = box_feats.shape
    K = wc.shape[0]
    B4 = wb.shape[0]
    KO = K + B4
    # Host-side prep: PyTorch Linear weights are already (out, in), so just
    # stack them: (KO, C) bf16 weight + (KO, 1) f32 bias column.
    w_all = jnp.concatenate([wc, wb], axis=0).astype(jnp.bfloat16)
    b_all = jnp.concatenate([bc, bb])[:, None].astype(jnp.float32)
    # Cast to bf16 BEFORE the transpose so the host-side transpose moves half
    # the bytes; R lands on the lane axis.
    x_T = box_feats.astype(jnp.bfloat16).T                           # (C, R)

    tile_r, Rp = _pick_lane_tiling(R, tile_r)
    if Rp != R:
        x_T = jnp.pad(x_T, ((0, 0), (0, Rp - R)))

    vmem_est = (2 * C * tile_r * 2            # x tiles, double-buffered
                + 2 * KO * tile_r * 4         # out tiles, double-buffered
                + 2 * KO * C * 2              # weight (VMEM-resident, 2 bufs)
                + 2 * 16 * LANE * 4)          # bias column, lane-padded to 128
    # TODO(synk): at tiny R (a handful of RoIs) this pallas_call is mostly
    # launch overhead vs. a plain XLA dot / fusing into the mask call.
    out = pl.pallas_call(
        box_predictor_kernel,
        out_shape=jax.ShapeDtypeStruct((KO, Rp), jnp.float32),
        grid=(Rp // tile_r,),
        in_specs=[pl.BlockSpec((C, tile_r), lambda i: (0, i)),
                  pl.BlockSpec((KO, C), lambda i: (0, 0)),     # VMEM-resident
                  pl.BlockSpec((KO, 1), lambda i: (0, 0))],
        out_specs=pl.BlockSpec((KO, tile_r), lambda i: (0, i)),
        compiler_params=pltpu.CompilerParams(
            dimension_semantics=("parallel",),
            vmem_limit_bytes=_vmem_limit(vmem_est)),
    )(x_T, w_all, b_all)
    out = out[:, :R]
    return out[:K].T, out[K:].T


# ----------------------------------------------------------------------------
# MaskRCNNPredictor: ConvTranspose2d(k=2,s=2) + ReLU + Conv2d(1x1), fused.
# Transposed layout: channels on sublanes, P = R*H*W on the 128-lane axis.
#   x_T      : (Cin, TILE_P)        bf16
#   wt_all_T : (4*HID, Cin)         bf16   row-block t = tap (di*2+dj)
#   bt_col   : (4*HID, 1)           f32
#   w2_block : (4K, 4*HID)          bf16   block-diagonal 1x1-conv weight
#   b2_col   : (4K, 1)              f32
#   out      : (4K, TILE_P)         f32    lane-dense stores
# ----------------------------------------------------------------------------
def mask_predictor_kernel(x_ref, wt_ref, bt_ref, w2_ref, b2_ref, out_ref):
    # All 4 deconv taps in one lane-dense bf16 MXU pass: (4*HID, C) @ (C, TP).
    h = jnp.dot(wt_ref[...], x_ref[...], preferred_element_type=jnp.float32)
    # bias + ReLU in f32 on the VPU, then drop to bf16 so the second matmul is
    # a single MXU pass (f32xf32 lowers to multi-pass bf16 emulation) and the
    # resident h temp is half the size.
    h = jnp.maximum(h + bt_ref[...], 0.0).astype(jnp.bfloat16)
    # All 4 taps' 1x1 conv in one block-diagonal bf16 matmul:
    # (4K, 4*HID) @ (4*HID, TP), f32 accumulation.
    out_ref[...] = (jnp.dot(w2_ref[...], h,
                            preferred_element_type=jnp.float32)
                    + b2_ref[...])


def run_mask_predictor(mask_feats_nchw, wdeconv, bt_vec, wconv1, b2_vec,
                       *, tile_p=2048):
    """mask_feats_nchw: (R, Cin, H, W) f32.
    wdeconv: ConvTranspose2d weight (Cin, Cout, 2, 2); bt_vec: (Cout,).
    wconv1: Conv2d 1x1 weight (K, Cout, 1, 1); b2_vec: (K,).

    tile_p: requested lane tile (rounded to a multiple of 128 and shrunk so the
    grid has >=2 steps when possible).  The default 2048 needs ~17 MiB of VMEM
    per step (requested explicitly via vmem_limit_bytes below) and is safe on
    every generation; 4096 is fine on v6e/v7x (64/128 MiB physical VMEM), and
    there is no point going past ~2048 on v5e (the kernel is MXU-bound there)."""
    R, Cin, H, W = mask_feats_nchw.shape
    Cout = wdeconv.shape[1]
    K = wconv1.shape[0]
    HID4 = 4 * Cout
    K4 = 4 * K
    P = R * H * W

    # --- host-side weight prep (bf16 so both matmuls are single-pass MXU) ----
    # (Cin, Cout, 2, 2) -> (di, dj, Cout, Cin) -> (4*Cout, Cin).
    wt_all_T = jnp.transpose(wdeconv, (2, 3, 1, 0)).reshape(HID4, Cin)
    wt_all_T = wt_all_T.astype(jnp.bfloat16)
    bt_col = jnp.tile(bt_vec, 4)[:, None].astype(jnp.float32)        # (4*Cout, 1)
    w2_T = wconv1[:, :, 0, 0].astype(jnp.float32)                    # (K, Cout)
    w2_block = jnp.kron(jnp.eye(4, dtype=jnp.float32), w2_T)         # (4K, 4*Cout)
    w2_block = w2_block.astype(jnp.bfloat16)
    b2_col = jnp.tile(b2_vec, 4)[:, None].astype(jnp.float32)        # (4K, 1)

    # NCHW -> (Cin, P): cast to bf16 BEFORE the transpose (halves the bytes the
    # host-side XLA transpose moves); channels on sublanes, RoI*spatial on lanes.
    x_T = jnp.transpose(mask_feats_nchw.astype(jnp.bfloat16),
                        (1, 0, 2, 3)).reshape(Cin, P)

    tile_p, Pp = _pick_lane_tiling(P, tile_p)
    if Pp != P:
        x_T = jnp.pad(x_T, ((0, 0), (0, Pp - P)))

    # Per-step VMEM budget: double-buffered x/out tiles, resident f32+bf16 h
    # temps, double-buffered weights and lane-padded (.,1) bias columns.
    vmem_est = (2 * Cin * tile_p * 2                 # x, bf16, 2 buffers
                + 2 * K4 * tile_p * 4                # out, f32, 2 buffers
                + HID4 * tile_p * (4 + 2)            # h: f32 MXU result + bf16
                + 2 * HID4 * Cin * 2                 # wt_all_T
                + 2 * K4 * HID4 * 2                  # w2_block
                + 2 * (HID4 + max(K4, 8)) * LANE * 4)  # bias cols lane-padded

    out = pl.pallas_call(
        mask_predictor_kernel,
        out_shape=jax.ShapeDtypeStruct((K4, Pp), jnp.float32),
        grid=(Pp // tile_p,),
        in_specs=[pl.BlockSpec((Cin, tile_p), lambda i: (0, i)),
                  pl.BlockSpec((HID4, Cin), lambda i: (0, 0)),   # VMEM-resident
                  pl.BlockSpec((HID4, 1), lambda i: (0, 0)),
                  pl.BlockSpec((K4, HID4), lambda i: (0, 0)),    # VMEM-resident
                  pl.BlockSpec((K4, 1), lambda i: (0, 0))],
        out_specs=pl.BlockSpec((K4, tile_p), lambda i: (0, i)),
        compiler_params=pltpu.CompilerParams(
            dimension_semantics=("parallel",),     # shards grid across v7x TCs
            vmem_limit_bytes=_vmem_limit(vmem_est)),
    )(x_T, wt_all_T, bt_col, w2_block, b2_col)

    out = out[:, :P]
    # (t*K + k, r*H*W + i*W + j), t = di*2 + dj  ->  NCHW (r, k, 2i+di, 2j+dj).
    # TODO(synk): a channel-last consumer could take (R, 2H, 2W, K) directly
    # (or bf16) and skip this 6-D transpose; kept to preserve NCHW f32 output.
    out = out.reshape(2, 2, K, R, H, W)
    logits = jnp.transpose(out, (3, 2, 4, 0, 5, 1)).reshape(R, K, 2 * H, 2 * W)
    return logits


# ----------------------------------------------------------------------------
# Pure-JAX f32 references (independent formulation, NCHW / PyTorch semantics).
# ----------------------------------------------------------------------------
def ref_box_predictor(x, wc, bc, wb, bb):
    return (jnp.dot(x, wc.T, precision=HI) + bc,
            jnp.dot(x, wb.T, precision=HI) + bb)


def ref_mask_predictor(x_nchw, wdeconv, bt_vec, wconv1, b2_vec):
    R, Cin, H, W = x_nchw.shape
    Cout = wdeconv.shape[1]
    up = jnp.zeros((R, Cout, 2 * H, 2 * W), jnp.float32)
    for di in range(2):
        for dj in range(2):
            tap = jnp.einsum('ncij,ck->nkij', x_nchw, wdeconv[:, :, di, dj],
                             precision=HI)
            up = up.at[:, :, di::2, dj::2].set(tap)
    up = jnp.maximum(up + bt_vec[None, :, None, None], 0.0)
    out = jnp.einsum('nchw,kc->nkhw', up, wconv1[:, :, 0, 0], precision=HI)
    return out + b2_vec[None, :, None, None]


if __name__ == "__main__":
    key = jax.random.PRNGKey(0)
    k_box, k_mask, k_p1, k_p2, k_p3, k_p4 = jax.random.split(key, 6)

    # RoI-level head inputs (what the replaced predictors actually consume).
    R = 8                        # number of RoIs
    IN_FEAT = 1024               # box-head feature dim (resnet50-fpn)
    C_MASK = 256                 # mask-head in_channels
    HIDDEN = 256                 # hidden_layer
    NUM_CLASSES = 2
    HM = WM = 8                  # small mask-head spatial size

    box_feats = jax.random.normal(k_box, (R, IN_FEAT), jnp.float32)
    mask_feats = jax.random.normal(k_mask, (R, C_MASK, HM, WM), jnp.float32)

    # FastRCNNPredictor params (PyTorch layout: Linear weight = (out, in)).
    wc = 0.02 * jax.random.normal(k_p1, (NUM_CLASSES, IN_FEAT), jnp.float32)
    bc = jnp.zeros((NUM_CLASSES,), jnp.float32)
    wb = 0.02 * jax.random.normal(k_p2, (NUM_CLASSES * 4, IN_FEAT), jnp.float32)
    bb = jnp.zeros((NUM_CLASSES * 4,), jnp.float32)

    # MaskRCNNPredictor params.
    wdeconv = 0.02 * jax.random.normal(k_p3, (C_MASK, HIDDEN, 2, 2), jnp.float32)
    bt = 0.01 * jnp.ones((HIDDEN,), jnp.float32)
    wconv1 = 0.02 * jax.random.normal(k_p4, (NUM_CLASSES, HIDDEN, 1, 1),
                                      jnp.float32)
    b2 = jnp.zeros((NUM_CLASSES,), jnp.float32)

    # --- Run Pallas kernels --------------------------------------------------
    cls_scores, bbox_deltas = run_box_predictor(box_feats, wc, bc, wb, bb)
    mask_logits = run_mask_predictor(mask_feats, wdeconv, bt, wconv1, b2,
                                     tile_p=2048)
    jax.block_until_ready((cls_scores, bbox_deltas, mask_logits))

    # --- Verify against pure-JAX f32 references ------------------------------
    cls_ref, bbox_ref = ref_box_predictor(box_feats, wc, bc, wb, bb)
    mask_ref = ref_mask_predictor(mask_feats, wdeconv, bt, wconv1, b2)

    # bf16 MXU inputs (and a bf16 h intermediate) with f32 accumulation vs an
    # f32 reference: tolerance covers the bf16 rounding error (abs err << 1e-2).
    assert jnp.allclose(cls_scores, cls_ref, atol=2e-2, rtol=2e-2)
    assert jnp.allclose(bbox_deltas, bbox_ref, atol=2e-2, rtol=2e-2)
    assert jnp.allclose(mask_logits, mask_ref, atol=2e-2, rtol=2e-2)
    assert cls_scores.shape == (R, NUM_CLASSES)
    assert bbox_deltas.shape == (R, NUM_CLASSES * 4)
    assert mask_logits.shape == (R, NUM_CLASSES, 2 * HM, 2 * WM)

    print("KERNEL_OK")
</pallas_src>

<mosaic_0001>
module attributes {stable_mosaic.version = 11 : i64} {
  func.func @box_predictor_kernel(%arg0: i32, %arg1: memref<1024x128xbf16, #tpu.memory_space<vmem>>, %arg2: memref<10x1024xbf16, #tpu.memory_space<vmem>>, %arg3: memref<10x1xf32, #tpu.memory_space<vmem>>, %arg4: memref<10x128xf32, #tpu.memory_space<vmem>>) attributes {dimension_semantics = [#tpu.dimension_semantics<parallel>], iteration_bounds = array<i64: 1>, scalar_prefetch = 0 : i64, scratch_operands = 0 : i64, tpu.core_type = #tpu.core_type<tc>, window_params = [{transform_indices = @transform_0, window_bounds = array<i64: 1024, 128>}, {pipeline_mode = #tpu.pipeline_mode<synchronous>, transform_indices = @transform_1, window_bounds = array<i64: 10, 1024>}, {pipeline_mode = #tpu.pipeline_mode<synchronous>, transform_indices = @transform_2, window_bounds = array<i64: 10, 1>}, {transform_indices = @transform_3, window_bounds = array<i64: 10, 128>}]} {
    %c0 = arith.constant 0 : index
    %c0_0 = arith.constant 0 : index
    %0 = vector.load %arg2[%c0, %c0_0] : memref<10x1024xbf16, #tpu.memory_space<vmem>>, vector<10x1024xbf16>
    %c0_1 = arith.constant 0 : index
    %c0_2 = arith.constant 0 : index
    %1 = vector.load %arg1[%c0_1, %c0_2] : memref<1024x128xbf16, #tpu.memory_space<vmem>>, vector<1024x128xbf16>
    %cst = arith.constant dense<0.000000e+00> : vector<10x128xf32>
    %2 = tpu.matmul %0, %1, %cst {dimension_numbers = #tpu.dot_dimension_numbers<[1], [0], [0], [1], [0, 0, 1, 1], [], []>} : vector<10x1024xbf16>, vector<1024x128xbf16>, vector<10x128xf32> -> vector<10x128xf32>
    %c0_3 = arith.constant 0 : index
    %c0_4 = arith.constant 0 : index
    %3 = vector.load %arg3[%c0_3, %c0_4] : memref<10x1xf32, #tpu.memory_space<vmem>>, vector<10x1xf32>
    %4 = vector.broadcast %3 : vector<10x1xf32> to vector<10x128xf32>
    %5 = arith.addf %2, %4 : vector<10x128xf32>
    %c0_5 = arith.constant 0 : index
    %c0_6 = arith.constant 0 : index
    %6 = vector.load %arg4[%c0_5, %c0_6] : memref<10x128xf32, #tpu.memory_space<vmem>>, vector<10x128xf32>
    tpu.vector_store %arg4[%c0_5, %c0_6], %5 {strides = array<i32>} : memref<10x128xf32, #tpu.memory_space<vmem>>, vector<10x128xf32>,
    return
  }
  func.func @transform_0(%arg0: i32) -> (i32, i32) {
    %c0_i32 = arith.constant 0 : i32
    %c0_i32_0 = arith.constant 0 : i32
    return %c0_i32, %arg0 : i32, i32
  }
  func.func @transform_1(%arg0: i32) -> (i32, i32) {
    %c0_i32 = arith.constant 0 : i32
    %c0_i32_0 = arith.constant 0 : i32
    %c0_i32_1 = arith.constant 0 : i32
    return %c0_i32, %c0_i32_0 : i32, i32
  }
  func.func @transform_2(%arg0: i32) -> (i32, i32) {
    %c0_i32 = arith.constant 0 : i32
    %c0_i32_0 = arith.constant 0 : i32
    %c0_i32_1 = arith.constant 0 : i32
    return %c0_i32, %c0_i32_0 : i32, i32
  }
  func.func @transform_3(%arg0: i32) -> (i32, i32) {
    %c0_i32 = arith.constant 0 : i32
    %c0_i32_0 = arith.constant 0 : i32
    return %c0_i32, %arg0 : i32, i32
  }
}

</mosaic_0001>

<bundles_post_ra>
// kernel: tpu_custom_call.1
= control target key start
LH: loop header
LB: loop body
LE: loop exit
PB: predicated region body
PF: predicated region fallthrough
CT: control target
= control target key end

     0   :  { %8 = vsyncpa [#allocation3], 0  ;;  %s1179_s0 = inlined_call_operand.hbm [shape: bf16[1024,128], index: 0, kind: input, shape index: {}]   ;;  %s1180_s1 = inlined_call_operand.hbm [shape: bf16[10,1024], index: 1, kind: input, shape index: {}]   ;;  %s1181_s2 = inlined_call_operand.vmem [shape: f32[10,1], index: 2, kind: input, shape index: {}]   ;;  %s1182_s3 = inlined_call_operand.hbm [shape: f32[10,128], index: 3, kind: output, shape index: {}]  }
   0x1   :  { %9 = vsyncpa [#allocation6], 0 }
   0x2   :  { %10 = vsyncpa [#allocation4], 0  ;;  %s1107_s12 = smov [#allocation2]   ;;  %s1035_s16 = scalar_lea.hbm %s1179_s0, 8192 }
   0x3   :  { %s16_s13 = sshll.u32 %s1107_s12, 4  ;;  %p1036_p0 = scmp.ne.s32.totalorder %s1179_s0, %s1035_s16  ;;  %s17_s13 = int_to_ptr.vmem [resolvable:$true] %s16_s13 }
   0x4   :  { %p1039_p1 = scmp.lt.u32.totalorder %s1035_s16, %s1179_s0 }
   0x6   :  { %p1041_p2 = pnand %p1039_p1, %p1036_p0 }
   0x8   :  { %1044 = shalt.err (!%p1041_p2)
}
   0x9   :  { %s1045_s21 = scalar_lea.vmem %s17_s13, 8192  ;;  %p1050_p4 = scmp.lt.s32.totalorder %s17_s13, %s17_s13 }
   0xa   :  { %p1046_p3 = scmp.ne.s32.totalorder %s17_s13, %s1045_s21  ;;  %p1051_p5 = scmp.lt.s32.totalorder %s1045_s21, %s1045_s21 }
   0xc   :  { %p1052_p6 = por %p1051_p5, %p1050_p4 }
   0xe   :  { %p1053_p7 = pnand %p1052_p6, %p1046_p3 }
  0x10   :  { %1056 = shalt.err (!%p1053_p7)
}
  0x11   :  { %s1108_s22 = smov 64   ;;  %s1109_s23 = smov 4  }
  0x12   :  { %22 = dma.hbm_to_vmem [thread:$0]  %s1179_s0, 8192, %s17_s13, [#allocation3], %s1108_s22, %s1108_s22, %s1109_s23  }
  0x13   :  { %s1110_s26 = smov [#allocation5]   ;;  %s1057_s30 = scalar_lea.hbm %s1180_s1, 1024 }
  0x14   :  { %s28_s27 = sshll.u32 %s1110_s26, 4  ;;  %p1058_p8 = scmp.ne.s32.totalorder %s1180_s1, %s1057_s30  ;;  %s29_s27 = int_to_ptr.vmem [resolvable:$true] %s28_s27 }
  0x15   :  { %p1061_p9 = scmp.lt.u32.totalorder %s1057_s30, %s1180_s1 }
  0x17   :  { %p1063_p10 = pnand %p1061_p9, %p1058_p8 }
  0x19   :  { %1066 = shalt.err (!%p1063_p10)
}
  0x1a   :  { %s1067_s8 = scalar_lea.vmem %s29_s27, 1024  ;;  %p1072_p12 = scmp.lt.s32.totalorder %s29_s27, %s29_s27 }
  0x1b   :  { %p1068_p11 = scmp.ne.s32.totalorder %s29_s27, %s1067_s8  ;;  %p1073_p13 = scmp.lt.s32.totalorder %s1067_s8, %s1067_s8 }
  0x1d   :  { %p1074_p0 = por %p1073_p13, %p1072_p12 }
  0x1f   :  { %p1075_p1 = pnand %p1074_p0, %p1068_p11 }
  0x21   :  { %1078 = shalt.err (!%p1075_p1)
}
  0x22   :  { %s1111_s0 = smov 512   ;;  %s1112_s9 = smov 32  }
  0x23   :  { %34 = dma.hbm_to_vmem [thread:$0]  %s1180_s1, 1024, %s29_s27, [#allocation6], %s1111_s0, %s1111_s0, %s1112_s9  }
  0x24   :  { %1101 = dma.done.wait [#allocation3], 8192  }
  0x25   :  { %1102 = vsyncadd [#allocation3], 4294959104 }
  0x26   :  { %1103 = dma.done.wait [#allocation6], 1024  }
  0x27   :  { %1104 = vsyncadd [#allocation6], 4294966272  ;;  %v1113_v0 = vmov 0   ;;  %v971_v1 = vld [vmem:[#allocation2 + $0x40] sm:$0xff]   ;;  %v975_v5 = vld [vmem:[#allocation2 + $0x48] sm:$0xff]  }
  0x28   :  { %970 = vset.pattern.permute.xlu0 %v1113_v0  ;;  %v972_v2 = vld [vmem:[#allocation2 + $0xc0] sm:$0xff]   ;;  %872 = vmatprep.subr.bf16.mxu0 %v971_v1  ;;  %v976_v6 = vld [vmem:[#allocation2 + $0xc8] sm:$0xff]   ;;  %v979_v9 = vld [vmem:[#allocation2 + $0x50] sm:$0xff]  }
  0x29   :  { %v973_v3 = vld [vmem:[#allocation2] sm:$0xff]   ;;  %894 = vmatprep.subr.bf16.mxu1 %v972_v2  ;;  %v977_v7 = vld [vmem:[#allocation2 + $0x8] sm:$0xff]   ;;  %v980_v10 = vld [vmem:[#allocation2 + $0xd0] sm:$0xff]  }
  0x2a   :  { %v974_v4 = vld [vmem:[#allocation2 + $0x80] sm:$0xff]   ;;  %873 = vmatpush3.bf16.msra.mxu0 %v973_v3  ;;  %v978_v8 = vld [vmem:[#allocation2 + $0x88] sm:$0xff]   ;;  %v981_v11 = vld [vmem:[#allocation2 + $0x10] sm:$0xff]  }
  0x2b   :  { %895 = vmatpush3.bf16.msra.mxu1 %v974_v4  ;;  %874 = vmatprep.subr.bf16.mxu0 %v975_v5  ;;  %v982_v12 = vld [vmem:[#allocation2 + $0x90] sm:$0xff]   ;;  %v983_v13 = vld [vmem:[#allocation2 + $0x58] sm:$0xff]   ;;  %v987_v17 = vld [vmem:[#allocation2 + $0x60] sm:$0xff]  }
  0x2c   :  { %896 = vmatprep.subr.bf16.mxu1 %v976_v6  ;;  %v984_v14 = vld [vmem:[#allocation2 + $0xd8] sm:$0xff]   ;;  %v988_v18 = vld [vmem:[#allocation2 + $0xe0] sm:$0xff]   ;;  %v991_v21 = vld [vmem:[#allocation2 + $0x68] sm:$0xff]  }
  0x2d   :  { %v985_v15 = vld [vmem:[#allocation2 + $0x18] sm:$0xff]   ;;  %v989_v19 = vld [vmem:[#allocation2 + $0x20] sm:$0xff]   ;;  %v992_v22 = vld [vmem:[#allocation2 + $0xe8] sm:$0xff]  }
  0x2e   :  { %875 = vmatpush3.bf16.msra.mxu0 %v977_v7  ;;  %v986_v16 = vld [vmem:[#allocation2 + $0x98] sm:$0xff]   ;;  %v990_v20 = vld [vmem:[#allocation2 + $0xa0] sm:$0xff]   ;;  %v993_v23 = vld [vmem:[#allocation2 + $0x28] sm:$0xff]  }
  0x2f   :  { %897 = vmatpush3.bf16.msra.mxu1 %v978_v8  ;;  %876 = vmatprep.subr.bf16.mxu0 %v979_v9  ;;  %v994_v24 = vld [vmem:[#allocation2 + $0xa8] sm:$0xff]   ;;  %v995_v25 = vld [vmem:[#allocation2 + $0x70] sm:$0xff]   ;;  %v999_v29 = vld [vmem:[#allocation2 + $0x78] sm:$0xff]  }
  0x30   :  { %898 = vmatprep.subr.bf16.mxu1 %v980_v10  ;;  %v996_v26 = vld [vmem:[#allocation2 + $0xf0] sm:$0xff]   ;;  %v1000_v30 = vld [vmem:[#allocation2 + $0xf8] sm:$0xff]   ;;  %v44_v33 = vld [vmem:[#allocation5] sm:$0xff] }
  0x31   :  { %v997_v27 = vld [vmem:[#allocation2 + $0x30] sm:$0xff]   ;;  %v1001_v31 = vld [vmem:[#allocation2 + $0x38] sm:$0xff]   ;;  %v48_v34 = vld [vmem:[#allocation5 + $0x20] sm:$0x11] }
  0x32   :  { %877 = vmatpush3.bf16.msra.mxu0 %v981_v11  ;;  %v998_v28 = vld [vmem:[#allocation2 + $0xb0] sm:$0xff]   ;;  %v1002_v32 = vld [vmem:[#allocation2 + $0xb8] sm:$0xff]   ;;  %v45_v35 = vld [vmem:[#allocation5 + $0x8] sm:$0xff]  ;;  %v800_v36 = vcombine.low %v44_v33, %v48_v34  ;;  %v801_v37 = vcombine.high %v44_v33, %v48_v34 }
  0x33   :  { %899 = vmatpush3.bf16.msra.mxu1 %v982_v12  ;;  %878 = vmatprep.subr.bf16.mxu0 %v983_v13  ;;  %v49_v38 = vld [vmem:[#allocation5 + $0x28] sm:$0x11]  ;;  %v1003_v41 = vld [vmem:[#allocation2 + $0x140] sm:$0xff]   ;;  %v1011_v49 = vld [vmem:[#allocation2 + $0x150] sm:$0xff]  }
  0x34   :  { %900 = vmatprep.subr.bf16.mxu1 %v984_v14  ;;  %v802_v39 = vcombine.low %v45_v35, %v49_v38  ;;  %v803_v40 = vcombine.high %v45_v35, %v49_v38  ;;  %648 = vmatprep.mubr.bf16.mxu0 %v801_v37  ;;  %v1004_v42 = vld [vmem:[#allocation2 + $0x1c0] sm:$0xff]   ;;  %v1007_v45 = vld [vmem:[#allocation2 + $0x148] sm:$0xff]   ;;  %v1012_v50 = vld [vmem:[#allocation2 + $0x1d0] sm:$0xff]  }
  0x35   :  { %v1005_v43 = vld [vmem:[#allocation2 + $0x100] sm:$0xff]   ;;  %v1008_v46 = vld [vmem:[#allocation2 + $0x1c8] sm:$0xff]   ;;  %v1013_v51 = vld [vmem:[#allocation2 + $0x110] sm:$0xff]  }
  0x36   :  { %879 = vmatpush3.bf16.msra.mxu0 %v985_v15  ;;  %689 = vmatprep.mubr.bf16.mxu1 %v803_v40  ;;  %v1006_v44 = vld [vmem:[#allocation2 + $0x180] sm:$0xff]   ;;  %v1009_v47 = vld [vmem:[#allocation2 + $0x108] sm:$0xff]   ;;  %v1014_v52 = vld [vmem:[#allocation2 + $0x190] sm:$0xff]  }
  0x37   :  { %901 = vmatpush3.bf16.msra.mxu1 %v986_v16  ;;  %880 = vmatprep.subr.bf16.mxu0 %v987_v17  ;;  %v1010_v48 = vld [vmem:[#allocation2 + $0x188] sm:$0xff]   ;;  %v1015_v53 = vld [vmem:[#allocation2 + $0x158] sm:$0xff]   ;;  %v1019_v57 = vld [vmem:[#allocation2 + $0x160] sm:$0xff]  }
  0x38   :  { %902 = vmatprep.subr.bf16.mxu1 %v988_v18  ;;  %v1016_v54 = vld [vmem:[#allocation2 + $0x1d8] sm:$0xff]   ;;  %v1020_v58 = vld [vmem:[#allocation2 + $0x1e0] sm:$0xff]   ;;  %v1023_v61 = vld [vmem:[#allocation2 + $0x168] sm:$0xff]  }
  0x39   :  { %v1017_v55 = vld [vmem:[#allocation2 + $0x118] sm:$0xff]   ;;  %v1021_v59 = vld [vmem:[#allocation2 + $0x120] sm:$0xff]   ;;  %v1024_v62 = vld [vmem:[#allocation2 + $0x1e8] sm:$0xff]  }
  0x3a   :  { %881 = vmatpush3.bf16.msra.mxu0 %v989_v19  ;;  %v1018_v56 = vld [vmem:[#allocation2 + $0x198] sm:$0xff]   ;;  %v1022_v60 = vld [vmem:[#allocation2 + $0x1a0] sm:$0xff]   ;;  %v1025_v63 = vld [vmem:[#allocation2 + $0x128] sm:$0xff]  }
  0x3b   :  { %903 = vmatpush3.bf16.msra.mxu1 %v990_v20  ;;  %882 = vmatprep.subr.bf16.mxu0 %v991_v21  ;;  %v1026_v0 = vld [vmem:[#allocation2 + $0x1a8] sm:$0xff]   ;;  %v1027_v1 = vld [vmem:[#allocation2 + $0x170] sm:$0xff]   ;;  %v1031_v5 = vld [vmem:[#allocation2 + $0x178] sm:$0xff]  }
  0x3c   :  { %904 = vmatprep.subr.bf16.mxu1 %v992_v22  ;;  %v1028_v2 = vld [vmem:[#allocation2 + $0x1f0] sm:$0xff]   ;;  %v1032_v6 = vld [vmem:[#allocation2 + $0x1f8] sm:$0xff]   ;;  %v180_v15 = vld [vmem:[%s1181_s2] sm:$0xff] }
  0x3d   :  { %v1029_v3 = vld [vmem:[#allocation2 + $0x130] sm:$0xff]   ;;  %v1033_v7 = vld [vmem:[#allocation2 + $0x138] sm:$0xff]   ;;  %184 = vperm.xlu0 %970, %v180_v15   ;;  %v181_v18 = vld [vmem:[%s1181_s2 + $0x8] sm:$0x3]  ;;  %s1114_s2 = smov [#allocation7]  }
  0x3e   :  { %883 = vmatpush3.bf16.msra.mxu0 %v993_v23  ;;  %v1030_v4 = vld [vmem:[#allocation2 + $0x1b0] sm:$0xff]   ;;  %v1034_v8 = vld [vmem:[#allocation2 + $0x1b8] sm:$0xff]   ;;  %s787_s15 = sshll.u32 %s1114_s2, 4  ;;  %s788_s15 = int_to_ptr.vmem [resolvable:$true] %s787_s15 }
  0x3f   :  { %905 = vmatpush3.bf16.msra.mxu1 %v994_v24  ;;  %884 = vmatprep.subr.bf16.mxu0 %v995_v25  ;;  %v46_v9 = vld [vmem:[#allocation5 + $0x10] sm:$0xff]  ;;  %v47_v13 = vld [vmem:[#allocation5 + $0x18] sm:$0xff]  ;;  %s1079_s16 = scalar_lea.vmem %s788_s15, 256  ;;  %p1084_p3 = scmp.lt.s32.totalorder %s788_s15, %s788_s15 }
  0x40   :  { %906 = vmatprep.subr.bf16.mxu1 %v996_v26  ;;  %v50_v10 = vld [vmem:[#allocation5 + $0x30] sm:$0x11]  ;;  %v51_v14 = vld [vmem:[#allocation5 + $0x38] sm:$0x11]  ;;  %p1080_p2 = scmp.ne.s32.totalorder %s788_s15, %s1079_s16  ;;  %p1085_p4 = scmp.lt.s32.totalorder %s1079_s16, %s1079_s16 }
  0x41   :  { %v804_v11 = vcombine.low %v46_v9, %v50_v10  ;;  %v805_v12 = vcombine.high %v46_v9, %v50_v10  ;;  %v806_v16 = vcombine.low %v47_v13, %v51_v14  ;;  %v807_v17 = vcombine.high %v47_v13, %v51_v14  ;;  %189 = vperm.xlu0 %970, %v181_v18  }
  0x42   :  { %885 = vmatpush3.bf16.msra.mxu0 %v997_v27  ;;  %p1086_p5 = por %p1085_p4, %p1084_p3 }
  0x43   :  { %907 = vmatpush3.bf16.msra.mxu1 %v998_v28  ;;  %886 = vmatprep.subr.bf16.mxu0 %v999_v29 }
  0x44   :  { %908 = vmatprep.subr.bf16.mxu1 %v1000_v30  ;;  %p1087_p6 = pnand %p1086_p5, %p1080_p2 }
  0x46   :  { %887 = vmatpush3.bf16.msra.mxu0 %v1001_v31 }
  0x47   :  { %909 = vmatpush3.bf16.msra.mxu1 %v1002_v32  ;;  %916 = vmatprep.subr.bf16.mxu0 %v1003_v41 }
  0x48   :  { %938 = vmatprep.subr.bf16.mxu1 %v1004_v42 }
  0x49   :  { %649 = vmatmul.mubr.bf16.vlgmr.msra.gmra.mrb[0].mxu0 %v800_v36 }
  0x4a   :  { %690 = vmatmul.mubr.bf16.vlgmr.msra.gmra.mrb[0].mxu1 %v802_v39  ;;  %917 = vmatpush3.bf16.msra.mxu0 %v1005_v43 }
  0x4b   :  { %939 = vmatpush3.bf16.msra.mxu1 %v1006_v44  ;;  %918 = vmatprep.subr.bf16.mxu0 %v1007_v45 }
  0x4c   :  { %940 = vmatprep.subr.bf16.mxu1 %v1008_v46  ;;  %730 = vmatprep.mubr.bf16.mxu0 %v805_v12 }
  0x4d   :  { %771 = vmatprep.mubr.bf16.mxu1 %v807_v17 }
  0x4e   :  { %919 = vmatpush3.bf16.msra.mxu0 %v1009_v47 }
  0x4f   :  { %941 = vmatpush3.bf16.msra.mxu1 %v1010_v48  ;;  %920 = vmatprep.subr.bf16.mxu0 %v1011_v49 }
  0x50   :  { %942 = vmatprep.subr.bf16.mxu1 %v1012_v50 }
  0x52   :  { %921 = vmatpush3.bf16.msra.mxu0 %v1013_v51 }
  0x53   :  { %943 = vmatpush3.bf16.msra.mxu1 %v1014_v52  ;;  %922 = vmatprep.subr.bf16.mxu0 %v1015_v53 }
  0x54   :  { %944 = vmatprep.subr.bf16.mxu1 %v1016_v54 }
  0x56   :  { %923 = vmatpush3.bf16.msra.mxu0 %v1017_v55 }
  0x57   :  { %945 = vmatpush3.bf16.msra.mxu1 %v1018_v56  ;;  %924 = vmatprep.subr.bf16.mxu0 %v1019_v57 }
  0x58   :  { %946 = vmatprep.subr.bf16.mxu1 %v1020_v58 }
  0x5a   :  { %925 = vmatpush3.bf16.msra.mxu0 %v1021_v59 }
  0x5b   :  { %947 = vmatpush3.bf16.msra.mxu1 %v1022_v60  ;;  %926 = vmatprep.subr.bf16.mxu0 %v1023_v61 }
  0x5c   :  { %948 = vmatprep.subr.bf16.mxu1 %v1024_v62 }
  0x5e   :  { %927 = vmatpush3.bf16.msra.mxu0 %v1025_v63 }
  0x5f   :  { %949 = vmatpush3.bf16.msra.mxu1 %v1026_v0  ;;  %928 = vmatprep.subr.bf16.mxu0 %v1027_v1 }
  0x60   :  { %950 = vmatprep.subr.bf16.mxu1 %v1028_v2 }
  0x62   :  { %929 = vmatpush3.bf16.msra.mxu0 %v1029_v3 }
  0x63   :  { %951 = vmatpush3.bf16.msra.mxu1 %v1030_v4  ;;  %930 = vmatprep.subr.bf16.mxu0 %v1031_v5 }
  0x64   :  { %952 = vmatprep.subr.bf16.mxu1 %v1032_v6 }
  0x66   :  { %931 = vmatpush3.bf16.msra.mxu0 %v1033_v7 }
  0x67   :  { %953 = vmatpush3.bf16.msra.mxu1 %v1034_v8 }
  0x69   :  { %731 = vmatmul.mubr.bf16.vlgmr.msra.gmra.mrb[4].mxu0 %v804_v11 }
  0x6a   :  { %772 = vmatmul.mubr.bf16.vlgmr.msra.gmra.mrb[4].mxu1 %v806_v16 }
  0xbc   :  { %v185_v19 = vpop.permute.xlu0 %184 }
  0xc0   :  { %v190_v21 = vpop.permute.xlu0 %189 }
 0x11c   :  { %v888_v20 = vpop.f32.mrb[0].mxu0 }
 0x11d   :  { %v910_v22 = vpop.f32.mrb[0].mxu1  ;;  %v889_v23 = vpop.f32.mrb[1].mxu0 }
 0x11e   :  { %v890_v24 = vadd.f32 %v889_v23, %v888_v20  ;;  %v911_v25 = vpop.f32.mrb[1].mxu1  ;;  %v891_v26 = vpop.f32.mrb[2].mxu0 }
 0x11f   :  { %v912_v27 = vadd.f32 %v911_v25, %v910_v22  ;;  %v913_v28 = vpop.f32.mrb[2].mxu1  ;;  %v892_v29 = vpop.f32.mrb[3].mxu0 }
 0x120   :  { %v651_v30 = vadd.f32 %v890_v24, %v185_v19  ;;  %v893_v31 = vadd.f32 %v892_v29, %v891_v26  ;;  %v914_v32 = vpop.f32.mrb[3].mxu1 }
 0x121   :  { %v915_v33 = vadd.f32 %v914_v32, %v913_v28 }
 0x122   :  { %v692_v34 = vadd.f32 %v912_v27, %v651_v30  ;;  %v654_v35 = vadd.f32 %v893_v31, %v190_v21 }
 0x124   :  { %v695_v36 = vadd.f32 %v915_v33, %v654_v35 }
 0x13c   :  { %v932_v37 = vpop.f32.mrb[4].mxu0 }
 0x13d   :  { %v954_v38 = vpop.f32.mrb[4].mxu1  ;;  %v933_v39 = vpop.f32.mrb[5].mxu0 }
 0x13e   :  { %v934_v40 = vadd.f32 %v933_v39, %v932_v37  ;;  %v955_v41 = vpop.f32.mrb[5].mxu1  ;;  %v935_v42 = vpop.f32.mrb[6].mxu0 }
 0x13f   :  { %v956_v43 = vadd.f32 %v955_v41, %v954_v38  ;;  %v957_v44 = vpop.f32.mrb[6].mxu1  ;;  %v936_v45 = vpop.f32.mrb[7].mxu0 }
 0x140   :  { %v733_v46 = vadd.f32 %v934_v40, %v692_v34  ;;  %v937_v47 = vadd.f32 %v936_v45, %v935_v42  ;;  %v958_v48 = vpop.f32.mrb[7].mxu1 }
 0x141   :  { %v959_v49 = vadd.f32 %v958_v48, %v957_v44 }
 0x142   :  { %v774_v50 = vadd.f32 %v956_v43, %v733_v46  ;;  %v736_v51 = vadd.f32 %v937_v47, %v695_v36 }
 0x144   :  { %780 = vst [vmem:[#allocation7] sm:$0xff] %v774_v50  ;;  %v777_v52 = vadd.f32 %v959_v49, %v736_v51 }
 0x146   :  { %781 = vst [vmem:[#allocation7 + $0x8] sm:$0x3] %v777_v52 }
 0x147   :  { %1090 = shalt.err (!%p1087_p6)
}
 0x148   :  { %s1091_s19 = scalar_lea.hbm %s1182_s3, 256 }
 0x149   :  { %p1092_p7 = scmp.ne.s32.totalorder %s1182_s3, %s1091_s19  ;;  %p1095_p8 = scmp.lt.u32.totalorder %s1091_s19, %s1182_s3 }
 0x14b   :  { %p1097_p9 = pnand %p1095_p8, %p1092_p7 }
 0x14d   :  { %1100 = shalt.err (!%p1097_p9)
}
 0x14e   :  { %s1115_s24 = smov 128   ;;  %s1116_s25 = smov 8  }
 0x14f   :  { %793 = dma.vmem_to_hbm [thread:$0]  %s788_s15, 256, %s1182_s3, [#allocation4], %s1115_s24, %s1115_s24, %s1116_s25  }
 0x150   :  { %1105 = dma.done.wait [#allocation4], 256  }
 0x151   :  { %1106 = vsyncadd [#allocation4], 4294967040 }
 0x152   :  { %797 = vsyncpa [#allocation3], 1 }
 0x153   :  { %798 = vsyncpa [#allocation6], 1 }
 0x154   :  { %799 = vsyncpa [#allocation4], 1 }

</bundles_post_ra>
